<compile_context>
chip_gen: v7x
topology: tpu7x:2x2x1
jax: 0.10.0
libtpu: 0.0.40
codegen_flags: <defaults>
</compile_context>

<pallas_src>
import numpy as np
import jax
import jax.numpy as jnp
from jax.experimental import pallas as pl
from jax.experimental.pallas import tpu as pltpu

H_IN = 16                               # input spatial (forced by .view(-1, 32*32))
K = 5                                   # ConvTranspose2d kernel size
N_LAYERS = 4
H_OUT = H_IN + N_LAYERS * (K - 1)       # 32
FEAT_OUT = H_OUT * H_OUT                # 1024


def _round_up(n, m):
    return -(-n // m) * m


# ---------------------------------------------------------------------------
# Fused kernel: the whole (folded) network for one batch tile.
#   z_pi = x_pi @ W_pi + b_pi                      -> sigmoid
#   z_bs = x_be @ [W_beta | W_std] + [b_beta|b_std] -> relu / exp
# Weights use a constant index_map so they stay resident in VMEM across the
# batch grid; matmul operands are bf16, accumulation and activations are f32.
# ---------------------------------------------------------------------------
def fused_kernel(xpi_ref, xbe_ref, wpi_ref, wbs_ref, bpi_ref, bbs_ref,
                 pi_ref, beta_ref, std_ref):
    z_pi = jnp.dot(xpi_ref[...].astype(jnp.bfloat16), wpi_ref[...],
                   preferred_element_type=jnp.float32) + bpi_ref[...]
    z_bs = jnp.dot(xbe_ref[...].astype(jnp.bfloat16), wbs_ref[...],
                   preferred_element_type=jnp.float32) + bbs_ref[...]

    pi_ref[...] = 1.0 / (1.0 + jnp.exp(-z_pi))          # exact sigmoid
    d = beta_ref.shape[-1]                               # img_pad (static)
    beta_ref[...] = jnp.maximum(z_bs[:, :d], 0.0)
    std_ref[...] = jnp.exp(z_bs[:, d:])


# ---------------------------------------------------------------------------
# One-time weight preprocessing: compose the whole affine chain in f32.
# ---------------------------------------------------------------------------
def _deconv_as_matrix(w, hi, wi):
    """Dense M (f32, unpadded) with (x.reshape(B, hi*wi) @ M).reshape(B, ho, wo)
    == ConvTranspose2d(x, w)  (1->1 channel, stride 1, padding 0)."""
    kh, kw = w.shape
    ho, wo = hi + kh - 1, wi + kw - 1
    dh = jnp.arange(ho)[None, :] - jnp.arange(hi)[:, None]        # (hi, ho)
    dw = jnp.arange(wo)[None, :] - jnp.arange(wi)[:, None]        # (wi, wo)
    valid = (((dh >= 0) & (dh < kh))[:, None, :, None]
             & ((dw >= 0) & (dw < kw))[None, :, None, :])
    m = w[jnp.clip(dh, 0, kh - 1)[:, None, :, None],
          jnp.clip(dw, 0, kw - 1)[None, :, None, :]]              # (hi,wi,ho,wo)
    m = jnp.where(valid, m, 0.0)
    return m.reshape(hi * wi, ho * wo)


def pack_params(params):
    hp = jax.lax.Precision.HIGHEST

    # 1) Compose the 4 deconv layers into one (256, 1024) affine map (f32).
    hi = H_IN
    m_total, bias_total = None, None
    for (w, b) in params["deconv"]:
        ho = hi + K - 1
        m_l = _deconv_as_matrix(jnp.asarray(w, jnp.float32), hi, hi)
        b_l = jnp.full((ho * ho,), jnp.asarray(b, jnp.float32))
        if m_total is None:
            m_total, bias_total = m_l, b_l
        else:
            m_total = jnp.dot(m_total, m_l, precision=hp)
            bias_total = jnp.dot(bias_total, m_l, precision=hp) + b_l
        hi = ho

    # 2) Fold each Linear head through the composed deconv map (still f32).
    def fold_head(w, b):
        wf = jnp.asarray(w, jnp.float32)          # (img_dim, 1024)
        bf = jnp.asarray(b, jnp.float32)          # (img_dim,)
        w_tot = jnp.dot(m_total, wf.T, precision=hp)              # (256, img_dim)
        b_tot = jnp.dot(bias_total, wf.T, precision=hp) + bf      # (img_dim,)
        return w_tot, b_tot

    w_pi, b_pi = fold_head(*params["lin_pi"])
    w_be, b_be = fold_head(*params["lin_beta"])
    w_st, b_st = fold_head(*params["lin_std"])

    # 3) Lane-pad img_dim to a multiple of 128; cast weights to bf16 ONCE.
    img_dim = w_pi.shape[1]
    img_pad = _round_up(img_dim, 128)

    def pad_w(w):
        out = jnp.zeros((w.shape[0], img_pad), jnp.float32).at[:, :img_dim].set(w)
        return out.astype(jnp.bfloat16)

    def pad_b(bvec):
        return jnp.zeros((1, img_pad), jnp.float32).at[0, :img_dim].set(bvec)

    return dict(
        w_pi=pad_w(w_pi),                                          # (256, img_pad)
        w_bs=jnp.concatenate([pad_w(w_be), pad_w(w_st)], axis=1),  # (256, 2*img_pad)
        b_pi=pad_b(b_pi),                                          # (1, img_pad)
        b_bs=jnp.concatenate([pad_b(b_be), pad_b(b_st)], axis=1),  # (1, 2*img_pad)
    )


# ---------------------------------------------------------------------------
# Wrapper
# ---------------------------------------------------------------------------
def plain_deconv_generator(x_pi, x_beta, packed, *, img_dim):
    xp = jnp.asarray(x_pi, jnp.float32).reshape(-1, H_IN * H_IN)
    xb = jnp.asarray(x_beta, jnp.float32).reshape(-1, H_IN * H_IN)
    B = xp.shape[0]
    img_pad = packed["w_pi"].shape[1]

    # Batch tile: multiple of 8 (f32 sublane), minimal padding for small /
    # mid-size batches, 128 max (fills v5e MXU M, grid >= 2 for B > 128 so the
    # parallel axis spans both v7x TensorCores).  Post-fold the kernel is
    # overhead/DMA bound, not MXU bound, so 128 is plenty on v6e as well.
    BT = min(_round_up(B, 8), 128)
    Bp = _round_up(B, BT)
    if Bp != B:
        xp = jnp.pad(xp, ((0, Bp - B), (0, 0)))
        xb = jnp.pad(xb, ((0, Bp - B), (0, 0)))

    def const2d(a):
        # Constant index_map: no re-DMA across grid steps.  Total resident
        # weights are <0.5 MiB after folding, so default double-buffering of
        # these blocks is harmless even on v7x's 64 MiB VMEM.
        return pl.BlockSpec(a.shape, lambda i: (0, 0))

    x_spec = pl.BlockSpec((BT, H_IN * H_IN), lambda i: (i, 0))
    out_spec = pl.BlockSpec((BT, img_pad), lambda i: (i, 0))

    pi, beta, std = pl.pallas_call(
        fused_kernel,
        out_shape=tuple(jax.ShapeDtypeStruct((Bp, img_pad), jnp.float32)
                        for _ in range(3)),
        grid=(Bp // BT,),
        in_specs=[x_spec, x_spec,
                  const2d(packed["w_pi"]), const2d(packed["w_bs"]),
                  const2d(packed["b_pi"]), const2d(packed["b_bs"])],
        out_specs=(out_spec, out_spec, out_spec),
        compiler_params=pltpu.CompilerParams(
            dimension_semantics=("parallel",)),
    )(xp, xb, packed["w_pi"], packed["w_bs"], packed["b_pi"], packed["b_bs"])

    return pi[:B, :img_dim], beta[:B, :img_dim], std[:B, :img_dim]


# ---------------------------------------------------------------------------
# Deterministic parameter init (shapes follow the PyTorch module).
# ---------------------------------------------------------------------------
def init_params(key, img_dim):
    ks = jax.random.split(key, 2 * N_LAYERS + 6)
    deconv = []
    bound = 1.0 / np.sqrt(K * K)
    for l in range(N_LAYERS):
        w = jax.random.uniform(ks[2 * l], (K, K), jnp.float32, -bound, bound)
        b = jax.random.uniform(ks[2 * l + 1], (), jnp.float32, -bound, bound)
        deconv.append((w, b))                 # torch weight (1,1,5,5) squeezed
    lb = 1.0 / np.sqrt(FEAT_OUT)

    def lin(kw, kb):
        w = jax.random.uniform(kw, (img_dim, FEAT_OUT), jnp.float32, -lb, lb)
        b = jax.random.uniform(kb, (img_dim,), jnp.float32, -lb, lb)
        return (w, b)

    return {"deconv": deconv,
            "lin_pi": lin(ks[-6], ks[-5]),
            "lin_beta": lin(ks[-4], ks[-3]),
            "lin_std": lin(ks[-2], ks[-1])}


# ---------------------------------------------------------------------------
# Pure-JAX f32 reference (un-folded, layer-by-layer) for verification.
# ---------------------------------------------------------------------------
def reference(x_pi, x_beta, params):
    hp = jax.lax.Precision.HIGHEST

    def deconv(x, w, b):
        wf = w[::-1, ::-1][None, None]        # ConvTranspose == full conv
        y = jax.lax.conv_general_dilated(
            x, wf, window_strides=(1, 1),
            padding=((K - 1, K - 1), (K - 1, K - 1)),
            dimension_numbers=("NCHW", "OIHW", "NCHW"),
            precision=hp)
        return y + b

    def chain(x):
        h = jnp.asarray(x, jnp.float32).reshape(-1, 1, H_IN, H_IN)
        for (w, b) in params["deconv"]:
            h = deconv(h, w, b)
        return h.reshape(h.shape[0], FEAT_OUT)

    h_pi, h_be = chain(x_pi), chain(x_beta)
    w, b = params["lin_pi"]
    pi = jax.nn.sigmoid(jnp.dot(h_pi, w.T, precision=hp) + b)
    w, b = params["lin_beta"]
    beta = jax.nn.relu(jnp.dot(h_be, w.T, precision=hp) + b)
    w, b = params["lin_std"]
    std = jnp.exp(jnp.dot(h_be, w.T, precision=hp) + b)
    return pi, beta, std


if __name__ == "__main__":
    key = jax.random.PRNGKey(0)
    k_params, k_pi, k_be = jax.random.split(key, 3)
    img_dim = 256                              # PlainDeconvGenerator(_, img_dim)
    params = init_params(k_params, img_dim)
    packed = pack_params(params)               # one-time affine-chain folding

    B = 2
    x_pi = jax.random.normal(k_pi, (B, 1, H_IN, H_IN), jnp.float32)
    x_beta = jax.random.normal(k_be, (B, 1, H_IN, H_IN), jnp.float32)

    fwd = jax.jit(plain_deconv_generator, static_argnames=("img_dim",))
    pi, beta, std = fwd(x_pi, x_beta, packed, img_dim=img_dim)
    jax.block_until_ready((pi, beta, std))

    assert pi.shape == (B, img_dim)
    assert beta.shape == (B, img_dim)
    assert std.shape == (B, img_dim)

    pi_r, beta_r, std_r = reference(x_pi, x_beta, params)
    np.testing.assert_allclose(np.asarray(pi), np.asarray(pi_r),
                               rtol=1e-2, atol=1e-2)
    np.testing.assert_allclose(np.asarray(beta), np.asarray(beta_r),
                               rtol=1e-2, atol=1e-2)
    np.testing.assert_allclose(np.asarray(std), np.asarray(std_r),
                               rtol=1e-2, atol=1e-2)

    print("KERNEL_OK")
</pallas_src>

<mosaic_0001>
module attributes {stable_mosaic.version = 11 : i64} {
  func.func @fused_kernel(%arg0: i32, %arg1: memref<8x256xf32, #tpu.memory_space<vmem>>, %arg2: memref<8x256xf32, #tpu.memory_space<vmem>>, %arg3: memref<256x256xbf16, #tpu.memory_space<vmem>>, %arg4: memref<256x512xbf16, #tpu.memory_space<vmem>>, %arg5: memref<1x256xf32, #tpu.memory_space<vmem>>, %arg6: memref<1x512xf32, #tpu.memory_space<vmem>>, %arg7: memref<8x256xf32, #tpu.memory_space<vmem>>, %arg8: memref<8x256xf32, #tpu.memory_space<vmem>>, %arg9: memref<8x256xf32, #tpu.memory_space<vmem>>) attributes {dimension_semantics = [#tpu.dimension_semantics<parallel>], iteration_bounds = array<i64: 1>, scalar_prefetch = 0 : i64, scratch_operands = 0 : i64, tpu.core_type = #tpu.core_type<tc>, window_params = [{transform_indices = @transform_0, window_bounds = array<i64: 8, 256>}, {transform_indices = @transform_1, window_bounds = array<i64: 8, 256>}, {pipeline_mode = #tpu.pipeline_mode<synchronous>, transform_indices = @transform_2, window_bounds = array<i64: 256, 256>}, {pipeline_mode = #tpu.pipeline_mode<synchronous>, transform_indices = @transform_3, window_bounds = array<i64: 256, 512>}, {pipeline_mode = #tpu.pipeline_mode<synchronous>, transform_indices = @transform_4, window_bounds = array<i64: 1, 256>}, {pipeline_mode = #tpu.pipeline_mode<synchronous>, transform_indices = @transform_5, window_bounds = array<i64: 1, 512>}, {transform_indices = @transform_6, window_bounds = array<i64: 8, 256>}, {transform_indices = @transform_7, window_bounds = array<i64: 8, 256>}, {transform_indices = @transform_8, window_bounds = array<i64: 8, 256>}]} {
    %c0 = arith.constant 0 : index
    %c0_0 = arith.constant 0 : index
    %0 = vector.load %arg1[%c0, %c0_0] : memref<8x256xf32, #tpu.memory_space<vmem>>, vector<8x256xf32>
    %1 = arith.truncf %0 : vector<8x256xf32> to vector<8x256xbf16>
    %c0_1 = arith.constant 0 : index
    %c0_2 = arith.constant 0 : index
    %2 = vector.load %arg3[%c0_1, %c0_2] : memref<256x256xbf16, #tpu.memory_space<vmem>>, vector<256x256xbf16>
    %cst = arith.constant dense<0.000000e+00> : vector<8x256xf32>
    %3 = tpu.matmul %1, %2, %cst {dimension_numbers = #tpu.dot_dimension_numbers<[1], [0], [0], [1], [0, 0, 1, 1], [], []>} : vector<8x256xbf16>, vector<256x256xbf16>, vector<8x256xf32> -> vector<8x256xf32>
    %c0_3 = arith.constant 0 : index
    %c0_4 = arith.constant 0 : index
    %4 = vector.load %arg5[%c0_3, %c0_4] : memref<1x256xf32, #tpu.memory_space<vmem>>, vector<1x256xf32>
    %5 = vector.broadcast %4 : vector<1x256xf32> to vector<8x256xf32>
    %6 = arith.addf %3, %5 : vector<8x256xf32>
    %c0_5 = arith.constant 0 : index
    %c0_6 = arith.constant 0 : index
    %7 = vector.load %arg2[%c0_5, %c0_6] : memref<8x256xf32, #tpu.memory_space<vmem>>, vector<8x256xf32>
    %8 = arith.truncf %7 : vector<8x256xf32> to vector<8x256xbf16>
    %c0_7 = arith.constant 0 : index
    %c0_8 = arith.constant 0 : index
    %9 = vector.load %arg4[%c0_7, %c0_8] : memref<256x512xbf16, #tpu.memory_space<vmem>>, vector<256x512xbf16>
    %cst_9 = arith.constant dense<0.000000e+00> : vector<8x512xf32>
    %10 = tpu.matmul %8, %9, %cst_9 {dimension_numbers = #tpu.dot_dimension_numbers<[1], [0], [0], [1], [0, 0, 1, 1], [], []>} : vector<8x256xbf16>, vector<256x512xbf16>, vector<8x512xf32> -> vector<8x512xf32>
    %c0_10 = arith.constant 0 : index
    %c0_11 = arith.constant 0 : index
    %11 = vector.load %arg6[%c0_10, %c0_11] : memref<1x512xf32, #tpu.memory_space<vmem>>, vector<1x512xf32>
    %12 = vector.broadcast %11 : vector<1x512xf32> to vector<8x512xf32>
    %13 = arith.addf %10, %12 : vector<8x512xf32>
    %cst_12 = arith.constant 0.000000e+00 : f32
    %14 = vector.broadcast %cst_12 : f32 to vector<8x256xf32>
    %15 = arith.subf %14, %6 : vector<8x256xf32>
    %16 = math.exp %15 : vector<8x256xf32>
    %cst_13 = arith.constant 1.000000e+00 : f32
    %17 = vector.broadcast %cst_13 : f32 to vector<8x256xf32>
    %18 = arith.addf %17, %16 : vector<8x256xf32>
    %cst_14 = arith.constant 1.000000e+00 : f32
    %19 = vector.broadcast %cst_14 : f32 to vector<8x256xf32>
    %20 = arith.divf %19, %18 : vector<8x256xf32>
    %c0_15 = arith.constant 0 : index
    %c0_16 = arith.constant 0 : index
    %21 = vector.load %arg7[%c0_15, %c0_16] : memref<8x256xf32, #tpu.memory_space<vmem>>, vector<8x256xf32>
    tpu.vector_store %arg7[%c0_15, %c0_16], %20 {strides = array<i32>} : memref<8x256xf32, #tpu.memory_space<vmem>>, vector<8x256xf32>,
    %22 = vector.extract_strided_slice %13 {offsets = [0, 0], sizes = [8, 256], strides = [1, 1]} : vector<8x512xf32> to vector<8x256xf32>
    %cst_17 = arith.constant 0.000000e+00 : f32
    %23 = vector.broadcast %cst_17 : f32 to vector<8x256xf32>
    %24 = arith.maximumf %22, %23 : vector<8x256xf32>
    %c0_18 = arith.constant 0 : index
    %c0_19 = arith.constant 0 : index
    %25 = vector.load %arg8[%c0_18, %c0_19] : memref<8x256xf32, #tpu.memory_space<vmem>>, vector<8x256xf32>
    tpu.vector_store %arg8[%c0_18, %c0_19], %24 {strides = array<i32>} : memref<8x256xf32, #tpu.memory_space<vmem>>, vector<8x256xf32>,
    %26 = vector.extract_strided_slice %13 {offsets = [0, 256], sizes = [8, 256], strides = [1, 1]} : vector<8x512xf32> to vector<8x256xf32>
    %27 = math.exp %26 : vector<8x256xf32>
    %c0_20 = arith.constant 0 : index
    %c0_21 = arith.constant 0 : index
    %28 = vector.load %arg9[%c0_20, %c0_21] : memref<8x256xf32, #tpu.memory_space<vmem>>, vector<8x256xf32>
    tpu.vector_store %arg9[%c0_20, %c0_21], %27 {strides = array<i32>} : memref<8x256xf32, #tpu.memory_space<vmem>>, vector<8x256xf32>,
    return
  }
  func.func @transform_0(%arg0: i32) -> (i32, i32) {
    %c0_i32 = arith.constant 0 : i32
    %c0_i32_0 = arith.constant 0 : i32
    return %arg0, %c0_i32 : i32, i32
  }
  func.func @transform_1(%arg0: i32) -> (i32, i32) {
    %c0_i32 = arith.constant 0 : i32
    %c0_i32_0 = arith.constant 0 : i32
    return %arg0, %c0_i32 : i32, i32
  }
  func.func @transform_2(%arg0: i32) -> (i32, i32) {
    %c0_i32 = arith.constant 0 : i32
    %c0_i32_0 = arith.constant 0 : i32
    %c0_i32_1 = arith.constant 0 : i32
    return %c0_i32, %c0_i32_0 : i32, i32
  }
  func.func @transform_3(%arg0: i32) -> (i32, i32) {
    %c0_i32 = arith.constant 0 : i32
    %c0_i32_0 = arith.constant 0 : i32
    %c0_i32_1 = arith.constant 0 : i32
    return %c0_i32, %c0_i32_0 : i32, i32
  }
  func.func @transform_4(%arg0: i32) -> (i32, i32) {
    %c0_i32 = arith.constant 0 : i32
    %c0_i32_0 = arith.constant 0 : i32
    %c0_i32_1 = arith.constant 0 : i32
    return %c0_i32, %c0_i32_0 : i32, i32
  }
  func.func @transform_5(%arg0: i32) -> (i32, i32) {
    %c0_i32 = arith.constant 0 : i32
    %c0_i32_0 = arith.constant 0 : i32
    %c0_i32_1 = arith.constant 0 : i32
    return %c0_i32, %c0_i32_0 : i32, i32
  }
  func.func @transform_6(%arg0: i32) -> (i32, i32) {
    %c0_i32 = arith.constant 0 : i32
    %c0_i32_0 = arith.constant 0 : i32
    return %arg0, %c0_i32 : i32, i32
  }
  func.func @transform_7(%arg0: i32) -> (i32, i32) {
    %c0_i32 = arith.constant 0 : i32
    %c0_i32_0 = arith.constant 0 : i32
    return %arg0, %c0_i32 : i32, i32
  }
  func.func @transform_8(%arg0: i32) -> (i32, i32) {
    %c0_i32 = arith.constant 0 : i32
    %c0_i32_0 = arith.constant 0 : i32
    return %arg0, %c0_i32 : i32, i32
  }
}

</mosaic_0001>

<bundles_post_ra>
// kernel: plain_deconv_generator.1
= control target key start
LH: loop header
LB: loop body
LE: loop exit
PB: predicated region body
PF: predicated region fallthrough
CT: control target
= control target key end

     0   :  { %14 = vsyncpa [#allocation3], 0  ;;  %s1250_s0 = inlined_call_operand.vmem [shape: f32[8,256], index: 0, kind: input, shape index: {}]   ;;  %s1251_s1 = inlined_call_operand.vmem [shape: f32[8,256], index: 1, kind: input, shape index: {}]   ;;  %s1252_s2 = inlined_call_operand.hbm [shape: bf16[256,256], index: 2, kind: input, shape index: {}]   ;;  %s1253_s3 = inlined_call_operand.hbm [shape: bf16[256,512], index: 3, kind: input, shape index: {}]   ;;  %s1254_s4 = inlined_call_operand.vmem [shape: f32[1,256], index: 4, kind: input, shape index: {}]   ;;  %s1255_s5 = inlined_call_operand.vmem [shape: f32[1,512], index: 5, kind: input, shape index: {}]   ;;  %s1256_s6 = inlined_call_operand.vmem [shape: f32[8,256], index: 6, kind: output, shape index: {0}]   ;;  %s1257_s7 = inlined_call_operand.vmem [shape: f32[8,256], index: 7, kind: output, shape index: {1}]   ;;  %s1258_s8 = inlined_call_operand.vmem [shape: f32[8,256], index: 8, kind: output, shape index: {2}]  }
   0x1   :  { %15 = vsyncpa [#allocation5], 0  ;;  %s1139_s27 = smov [#allocation2]   ;;  %s1091_s9 = scalar_lea.hbm %s1252_s2, 4096 }
   0x2   :  { %s25_s28 = sshll.u32 %s1139_s27, 4  ;;  %p1092_p0 = scmp.ne.s32.totalorder %s1252_s2, %s1091_s9  ;;  %s26_s28 = int_to_ptr.vmem [resolvable:$true] %s25_s28 }
   0x3   :  { %p1095_p1 = scmp.lt.u32.totalorder %s1091_s9, %s1252_s2 }
   0x5   :  { %p1097_p2 = pnand %p1095_p1, %p1092_p0 }
   0x7   :  { %1100 = shalt.err (!%p1097_p2)
}
   0x8   :  { %s1101_s14 = scalar_lea.vmem %s26_s28, 4096  ;;  %p1106_p4 = scmp.lt.s32.totalorder %s26_s28, %s26_s28 }
   0x9   :  { %p1102_p3 = scmp.ne.s32.totalorder %s26_s28, %s1101_s14  ;;  %p1107_p5 = scmp.lt.s32.totalorder %s1101_s14, %s1101_s14 }
   0xb   :  { %p1108_p6 = por %p1107_p5, %p1106_p4 }
   0xd   :  { %p1109_p7 = pnand %p1108_p6, %p1102_p3 }
   0xf   :  { %1112 = shalt.err (!%p1109_p7)
}
  0x10   :  { %s1140_s15 = smov 128   ;;  %s1141_s16 = smov 8  }
  0x11   :  { %31 = dma.hbm_to_vmem [thread:$0]  %s1252_s2, 4096, %s26_s28, [#allocation3], %s1140_s15, %s1140_s15, %s1141_s16  }
  0x12   :  { %s1142_s19 = smov [#allocation4]   ;;  %s1113_s23 = scalar_lea.hbm %s1253_s3, 8192 }
  0x13   :  { %s37_s20 = sshll.u32 %s1142_s19, 4  ;;  %p1114_p8 = scmp.ne.s32.totalorder %s1253_s3, %s1113_s23  ;;  %s38_s20 = int_to_ptr.vmem [resolvable:$true] %s37_s20 }
  0x14   :  { %p1117_p9 = scmp.lt.u32.totalorder %s1113_s23, %s1253_s3 }
  0x16   :  { %p1119_p10 = pnand %p1117_p9, %p1114_p8 }
  0x18   :  { %1122 = shalt.err (!%p1119_p10)
}
  0x19   :  { %s1123_s29 = scalar_lea.vmem %s38_s20, 8192  ;;  %p1128_p12 = scmp.lt.s32.totalorder %s38_s20, %s38_s20 }
  0x1a   :  { %p1124_p11 = scmp.ne.s32.totalorder %s38_s20, %s1123_s29  ;;  %p1129_p13 = scmp.lt.s32.totalorder %s1123_s29, %s1123_s29 }
  0x1c   :  { %p1130_p0 = por %p1129_p13, %p1128_p12 }
  0x1e   :  { %p1131_p1 = pnand %p1130_p0, %p1124_p11 }
  0x20   :  { %1134 = shalt.err (!%p1131_p1)
}
  0x21   :  { %s1143_s2 = smov 256   ;;  %s1144_s28 = smov 16  }
  0x22   :  { %43 = dma.hbm_to_vmem [thread:$0]  %s1253_s3, 8192, %s38_s20, [#allocation5], %s1143_s2, %s1143_s2, %s1144_s28  }
  0x23   :  { %1135 = dma.done.wait [#allocation3], 4096  }
  0x24   :  { %1136 = vsyncadd [#allocation3], 4294963200 }
  0x25   :  { %1137 = dma.done.wait [#allocation5], 8192  }
  0x26   :  { %1138 = vsyncadd [#allocation5], 4294959104  ;;  %v935_v0 = vld [vmem:[#allocation2 + $0x4] ss:$8 sps:$4 sm:$0xff]   ;;  %v937_v1 = vld [vmem:[#allocation2] ss:$8 sps:$4 sm:$0xff]  }
  0x27   :  { %262 = vmatprep.subr.bf16.mxu0 %v935_v0  ;;  %v938_v2 = vld [vmem:[#allocation2 + $0x14] ss:$8 sps:$4 sm:$0xff]   ;;  %v940_v3 = vld [vmem:[#allocation2 + $0x10] ss:$8 sps:$4 sm:$0xff]   ;;  %v941_v4 = vld [vmem:[#allocation2 + $0x24] ss:$8 sps:$4 sm:$0xff]  }
  0x28   :  { %263 = vmatpush1.bf16.msra.mxu0 %v937_v1  ;;  %v943_v5 = vld [vmem:[#allocation2 + $0x20] ss:$8 sps:$4 sm:$0xff]   ;;  %v944_v6 = vld [vmem:[#allocation2 + $0x34] ss:$8 sps:$4 sm:$0xff]   ;;  %v946_v7 = vld [vmem:[#allocation2 + $0x30] ss:$8 sps:$4 sm:$0xff]  }
  0x29   :  { %264 = vmatprep.subr.bf16.mxu0 %v938_v2  ;;  %v947_v8 = vld [vmem:[#allocation2 + $0x44] ss:$8 sps:$4 sm:$0xff]   ;;  %v949_v9 = vld [vmem:[#allocation2 + $0x40] ss:$8 sps:$4 sm:$0xff]   ;;  %v950_v10 = vld [vmem:[#allocation2 + $0x54] ss:$8 sps:$4 sm:$0xff]  }
  0x2a   :  { %v952_v11 = vld [vmem:[#allocation2 + $0x50] ss:$8 sps:$4 sm:$0xff]   ;;  %v953_v12 = vld [vmem:[#allocation2 + $0x64] ss:$8 sps:$4 sm:$0xff]   ;;  %v955_v15 = vld [vmem:[#allocation2 + $0x60] ss:$8 sps:$4 sm:$0xff]  }
  0x2b   :  { %v55_v13 = vld [vmem:[%s1250_s0 + $0x8] sm:$0xff]  ;;  %v956_v16 = vld [vmem:[#allocation2 + $0x74] ss:$8 sps:$4 sm:$0xff]   ;;  %v958_v18 = vld [vmem:[#allocation2 + $0x70] ss:$8 sps:$4 sm:$0xff]  }
  0x2c   :  { %265 = vmatpush1.bf16.msra.mxu0 %v940_v3  ;;  %v57_v14 = vpack.c.bf16 %v55_v13, %v55_v13  ;;  %v989_v17 = vld [vmem:[#allocation4 + $0x4] ss:$16 sps:$4 sm:$0xff]   ;;  %v994_v20 = vld [vmem:[#allocation4] ss:$16 sps:$4 sm:$0xff]   ;;  %v985_v54 = vld [vmem:[#allocation4 + $0xc] ss:$16 sps:$4 sm:$0xff]  }
  0x2d   :  { %266 = vmatprep.subr.bf16.mxu0 %v941_v4  ;;  %v959_v19 = vld [vmem:[#allocation2 + $0x84] ss:$8 sps:$4 sm:$0xff]   ;;  %713 = vmatprep.subr.bf16.mxu1 %v989_v17  ;;  %v1000_v22 = vld [vmem:[#allocation4 + $0x20] ss:$16 sps:$4 sm:$0xff]   ;;  %v962_v25 = vld [vmem:[#allocation2 + $0x94] ss:$8 sps:$4 sm:$0xff]  }
  0x2e   :  { %294 = vmatprep.mubr.bf16.mxu0 %v57_v14  ;;  %v995_v21 = vld [vmem:[#allocation4 + $0x24] ss:$16 sps:$4 sm:$0xff]   ;;  %714 = vmatpush1.bf16.msra.mxu1 %v994_v20  ;;  %v961_v24 = vld [vmem:[#allocation2 + $0x80] ss:$8 sps:$4 sm:$0xff]   ;;  %v964_v28 = vld [vmem:[#allocation2 + $0x90] ss:$8 sps:$4 sm:$0xff]  }
  0x2f   :  { %715 = vmatprep.subr.bf16.mxu1 %v995_v21  ;;  %v1001_v23 = vld [vmem:[#allocation4 + $0x44] ss:$16 sps:$4 sm:$0xff]   ;;  %v1006_v26 = vld [vmem:[#allocation4 + $0x40] ss:$16 sps:$4 sm:$0xff]   ;;  %v304_v58 = vld [vmem:[%s1251_s1 + $0x8] sm:$0xff] }
  0x30   :  { %267 = vmatpush1.bf16.msra.mxu0 %v943_v5  ;;  %v1007_v27 = vld [vmem:[#allocation4 + $0x64] ss:$16 sps:$4 sm:$0xff]   ;;  %v1012_v30 = vld [vmem:[#allocation4 + $0x60] ss:$16 sps:$4 sm:$0xff]   ;;  %v983_v59 = vld [vmem:[#allocation4 + $0x8] ss:$16 sps:$4 sm:$0xff]   ;;  %v306_v60 = vpack.c.bf16 %v304_v58, %v304_v58 }
  0x31   :  { %268 = vmatprep.subr.bf16.mxu0 %v944_v6  ;;  %v965_v29 = vld [vmem:[#allocation2 + $0xa4] ss:$8 sps:$4 sm:$0xff]   ;;  %v967_v32 = vld [vmem:[#allocation2 + $0xa0] ss:$8 sps:$4 sm:$0xff]   ;;  %v968_v33 = vld [vmem:[#allocation2 + $0xb4] ss:$8 sps:$4 sm:$0xff]  }
  0x32   :  { %716 = vmatpush1.bf16.msra.mxu1 %v1000_v22  ;;  %v1013_v31 = vld [vmem:[#allocation4 + $0x84] ss:$16 sps:$4 sm:$0xff]   ;;  %v1018_v34 = vld [vmem:[#allocation4 + $0x80] ss:$16 sps:$4 sm:$0xff]   ;;  %v988_v61 = vld [vmem:[#allocation4 + $0x2c] ss:$16 sps:$4 sm:$0xff]   ;;  %745 = vmatprep.mubr.bf16.mxu1 %v306_v60 }
  0x33   :  { %717 = vmatprep.subr.bf16.mxu1 %v1001_v23  ;;  %v1019_v35 = vld [vmem:[#allocation4 + $0xa4] ss:$16 sps:$4 sm:$0xff]   ;;  %v970_v36 = vld [vmem:[#allocation2 + $0xb0] ss:$8 sps:$4 sm:$0xff]   ;;  %v973_v40 = vld [vmem:[#allocation2 + $0xc0] ss:$8 sps:$4 sm:$0xff]  }
  0x34   :  { %269 = vmatpush1.bf16.msra.mxu0 %v946_v7  ;;  %v971_v37 = vld [vmem:[#allocation2 + $0xc4] ss:$8 sps:$4 sm:$0xff]   ;;  %v1024_v38 = vld [vmem:[#allocation4 + $0xa0] ss:$16 sps:$4 sm:$0xff]   ;;  %v974_v41 = vld [vmem:[#allocation2 + $0xd4] ss:$8 sps:$4 sm:$0xff]  }
  0x35   :  { %270 = vmatprep.subr.bf16.mxu0 %v947_v8  ;;  %v1025_v39 = vld [vmem:[#allocation4 + $0xc4] ss:$16 sps:$4 sm:$0xff]   ;;  %v1030_v42 = vld [vmem:[#allocation4 + $0xc0] ss:$16 sps:$4 sm:$0xff]   ;;  %v986_v0 = vld [vmem:[#allocation4 + $0x28] ss:$16 sps:$4 sm:$0xff]  }
  0x36   :  { %718 = vmatpush1.bf16.msra.mxu1 %v1006_v26  ;;  %v1031_v43 = vld [vmem:[#allocation4 + $0xe4] ss:$16 sps:$4 sm:$0xff]   ;;  %v976_v44 = vld [vmem:[#allocation2 + $0xd0] ss:$8 sps:$4 sm:$0xff]   ;;  %v979_v48 = vld [vmem:[#allocation2 + $0xe0] ss:$8 sps:$4 sm:$0xff]  }
  0x37   :  { %719 = vmatprep.subr.bf16.mxu1 %v1007_v27  ;;  %v977_v45 = vld [vmem:[#allocation2 + $0xe4] ss:$8 sps:$4 sm:$0xff]   ;;  %v1036_v46 = vld [vmem:[#allocation4 + $0xe0] ss:$16 sps:$4 sm:$0xff]   ;;  %v980_v49 = vld [vmem:[#allocation2 + $0xf4] ss:$8 sps:$4 sm:$0xff]  }
  0x38   :  { %271 = vmatpush1.bf16.msra.mxu0 %v949_v9  ;;  %v1037_v47 = vld [vmem:[#allocation4 + $0x104] ss:$16 sps:$4 sm:$0xff]   ;;  %v1042_v50 = vld [vmem:[#allocation4 + $0x100] ss:$16 sps:$4 sm:$0xff]   ;;  %v993_v1 = vld [vmem:[#allocation4 + $0x4c] ss:$16 sps:$4 sm:$0xff]  }
  0x39   :  { %272 = vmatprep.subr.bf16.mxu0 %v950_v10  ;;  %v982_v51 = vld [vmem:[#allocation2 + $0xf0] ss:$8 sps:$4 sm:$0xff]   ;;  %v1043_v52 = vld [vmem:[#allocation4 + $0x124] ss:$16 sps:$4 sm:$0xff]   ;;  %v999_v5 = vld [vmem:[#allocation4 + $0x6c] ss:$16 sps:$4 sm:$0xff]  }
  0x3a   :  { %720 = vmatpush1.bf16.msra.mxu1 %v1012_v30  ;;  %v54_v53 = vld [vmem:[%s1250_s0] sm:$0xff]  ;;  %v991_v4 = vld [vmem:[#allocation4 + $0x48] ss:$16 sps:$4 sm:$0xff]   ;;  %v1005_v9 = vld [vmem:[#allocation4 + $0x8c] ss:$16 sps:$4 sm:$0xff]  }
  0x3b   :  { %721 = vmatprep.subr.bf16.mxu1 %v1013_v31  ;;  %v1048_v55 = vld [vmem:[#allocation4 + $0x120] ss:$16 sps:$4 sm:$0xff]   ;;  %v1049_v56 = vld [vmem:[#allocation4 + $0x144] ss:$16 sps:$4 sm:$0xff]   ;;  %v56_v57 = vpack.c.bf16 %v54_v53, %v54_v53  ;;  %v997_v8 = vld [vmem:[#allocation4 + $0x68] ss:$16 sps:$4 sm:$0xff]  }
  0x3c   :  { %273 = vmatpush1.bf16.msra.mxu0 %v952_v11  ;;  %v1054_v62 = vld [vmem:[#allocation4 + $0x140] ss:$16 sps:$4 sm:$0xff]   ;;  %v1055_v63 = vld [vmem:[#allocation4 + $0x164] ss:$16 sps:$4 sm:$0xff]   ;;  %v1011_v13 = vld [vmem:[#allocation4 + $0xac] ss:$16 sps:$4 sm:$0xff]  }
  0x3d   :  { %274 = vmatprep.subr.bf16.mxu0 %v953_v12  ;;  %v1060_v2 = vld [vmem:[#allocation4 + $0x160] ss:$16 sps:$4 sm:$0xff]   ;;  %v1061_v3 = vld [vmem:[#allocation4 + $0x184] ss:$16 sps:$4 sm:$0xff]   ;;  %v1003_v12 = vld [vmem:[#allocation4 + $0x88] ss:$16 sps:$4 sm:$0xff]  }
  0x3e   :  { %722 = vmatpush1.bf16.msra.mxu1 %v1018_v34  ;;  %v1066_v6 = vld [vmem:[#allocation4 + $0x180] ss:$16 sps:$4 sm:$0xff]   ;;  %v1067_v7 = vld [vmem:[#allocation4 + $0x1a4] ss:$16 sps:$4 sm:$0xff]   ;;  %v1017_v17 = vld [vmem:[#allocation4 + $0xcc] ss:$16 sps:$4 sm:$0xff]  }
  0x3f   :  { %723 = vmatprep.subr.bf16.mxu1 %v1019_v35  ;;  %v1072_v10 = vld [vmem:[#allocation4 + $0x1a0] ss:$16 sps:$4 sm:$0xff]   ;;  %v1073_v11 = vld [vmem:[#allocation4 + $0x1c4] ss:$16 sps:$4 sm:$0xff]   ;;  %v1023_v21 = vld [vmem:[#allocation4 + $0xec] ss:$16 sps:$4 sm:$0xff]  }
  0x40   :  { %275 = vmatpush1.bf16.msra.mxu0 %v955_v15  ;;  %v1075_v14 = vld [vmem:[#allocation4 + $0x1c0] ss:$16 sps:$4 sm:$0xff]   ;;  %v1076_v15 = vld [vmem:[#allocation4 + $0x1e4] ss:$16 sps:$4 sm:$0xff]   ;;  %v1021_v23 = vld [vmem:[#allocation4 + $0xe8] ss:$16 sps:$4 sm:$0xff]  }
  0x41   :  { %276 = vmatprep.subr.bf16.mxu0 %v956_v16  ;;  %v1009_v16 = vld [vmem:[#allocation4 + $0xa8] ss:$16 sps:$4 sm:$0xff]   ;;  %v303_v20 = vld [vmem:[%s1251_s1] sm:$0xff]  ;;  %v1035_v26 = vld [vmem:[#allocation4 + $0x12c] ss:$16 sps:$4 sm:$0xff]  }
  0x42   :  { %724 = vmatpush1.bf16.msra.mxu1 %v1024_v38  ;;  %v305_v22 = vpack.c.bf16 %v303_v20, %v303_v20  ;;  %v1033_v27 = vld [vmem:[#allocation4 + $0x128] ss:$16 sps:$4 sm:$0xff]   ;;  %v1047_v30 = vld [vmem:[#allocation4 + $0x16c] ss:$16 sps:$4 sm:$0xff]  }
  0x43   :  { %725 = vmatprep.subr.bf16.mxu1 %v1025_v39  ;;  %v1045_v31 = vld [vmem:[#allocation4 + $0x168] ss:$16 sps:$4 sm:$0xff]   ;;  %v1059_v34 = vld [vmem:[#allocation4 + $0x1ac] ss:$16 sps:$4 sm:$0xff]  }
  0x44   :  { %277 = vmatpush1.bf16.msra.mxu0 %v958_v18  ;;  %v1078_v18 = vld [vmem:[#allocation4 + $0x1e0] ss:$16 sps:$4 sm:$0xff]   ;;  %v1057_v35 = vld [vmem:[#allocation4 + $0x1a8] ss:$16 sps:$4 sm:$0xff]   ;;  %v1071_v38 = vld [vmem:[#allocation4 + $0x1ec] ss:$16 sps:$4 sm:$0xff]  }
  0x45   :  { %278 = vmatprep.subr.bf16.mxu0 %v959_v19  ;;  %v1015_v19 = vld [vmem:[#allocation4 + $0xc8] ss:$16 sps:$4 sm:$0xff]  }
  0x46   :  { %726 = vmatpush1.bf16.msra.mxu1 %v1030_v42  ;;  %v1069_v39 = vld [vmem:[#allocation4 + $0x1e8] ss:$16 sps:$4 sm:$0xff]  }
  0x47   :  { %727 = vmatprep.subr.bf16.mxu1 %v1031_v43  ;;  %v90_v43 = vld [vmem:[%s1254_s4] sm:$0x3] }
  0x48   :  { %279 = vmatpush1.bf16.msra.mxu0 %v961_v24  ;;  %v1029_v24 = vld [vmem:[#allocation4 + $0x10c] ss:$16 sps:$4 sm:$0xff]  }
  0x49   :  { %280 = vmatprep.subr.bf16.mxu0 %v962_v25  ;;  %v1027_v25 = vld [vmem:[#allocation4 + $0x108] ss:$16 sps:$4 sm:$0xff]  }
  0x4a   :  { %728 = vmatpush1.bf16.msra.mxu1 %v1036_v46 }
  0x4b   :  { %729 = vmatprep.subr.bf16.mxu1 %v1037_v47 }
  0x4c   :  { %281 = vmatpush1.bf16.msra.mxu0 %v964_v28  ;;  %v1041_v28 = vld [vmem:[#allocation4 + $0x14c] ss:$16 sps:$4 sm:$0xff]  }
  0x4d   :  { %282 = vmatprep.subr.bf16.mxu0 %v965_v29  ;;  %v1039_v29 = vld [vmem:[#allocation4 + $0x148] ss:$16 sps:$4 sm:$0xff]  }
  0x4e   :  { %730 = vmatpush1.bf16.msra.mxu1 %v1042_v50 }
  0x4f   :  { %731 = vmatprep.subr.bf16.mxu1 %v1043_v52 }
  0x50   :  { %283 = vmatpush1.bf16.msra.mxu0 %v967_v32  ;;  %v1053_v32 = vld [vmem:[#allocation4 + $0x18c] ss:$16 sps:$4 sm:$0xff]  }
  0x51   :  { %284 = vmatprep.subr.bf16.mxu0 %v968_v33  ;;  %v1051_v33 = vld [vmem:[#allocation4 + $0x188] ss:$16 sps:$4 sm:$0xff]  }
  0x52   :  { %732 = vmatpush1.bf16.msra.mxu1 %v1048_v55 }
  0x53   :  { %733 = vmatprep.subr.bf16.mxu1 %v1049_v56 }
  0x54   :  { %285 = vmatpush1.bf16.msra.mxu0 %v970_v36  ;;  %v1065_v36 = vld [vmem:[#allocation4 + $0x1cc] ss:$16 sps:$4 sm:$0xff]  }
  0x55   :  { %286 = vmatprep.subr.bf16.mxu0 %v971_v37  ;;  %v1063_v37 = vld [vmem:[#allocation4 + $0x1c8] ss:$16 sps:$4 sm:$0xff]  }
  0x56   :  { %734 = vmatpush1.bf16.msra.mxu1 %v1054_v62 }
  0x57   :  { %735 = vmatprep.subr.bf16.mxu1 %v1055_v63 }
  0x58   :  { %287 = vmatpush1.bf16.msra.mxu0 %v973_v40  ;;  %v92_v40 = vlaneseq }
  0x59   :  { %288 = vmatprep.subr.bf16.mxu0 %v974_v41 }
  0x5a   :  { %736 = vmatpush1.bf16.msra.mxu1 %v1060_v2  ;;  %v93_v41 = vshrl.u32 %v92_v40, 7 }
  0x5b   :  { %737 = vmatprep.subr.bf16.mxu1 %v1061_v3 }
  0x5c   :  { %289 = vmatpush1.bf16.msra.mxu0 %v976_v44  ;;  %v94_v42 = vsub.s32 0, %v93_v41  ;;  %v98_v44 = vsub.s32 1, %v93_v41 }
  0x5d   :  { %290 = vmatprep.subr.bf16.mxu0 %v977_v45 }
  0x5e   :  { %738 = vmatpush1.bf16.msra.mxu1 %v1066_v6  ;;  %v95_v45 = vrot.slane %v90_v43, %v94_v42  ;;  %v99_v46 = vrot.slane %v90_v43, %v98_v44 }
  0x5f   :  { %739 = vmatprep.subr.bf16.mxu1 %v1067_v7 }
  0x60   :  { %291 = vmatpush1.bf16.msra.mxu0 %v979_v48 }
  0x61   :  { %292 = vmatprep.subr.bf16.mxu0 %v980_v49 }
  0x62   :  { %740 = vmatpush1.bf16.msra.mxu1 %v1072_v10  ;;  %v383_v10 = vsub.s32 2, %v93_v41 }
  0x63   :  { %741 = vmatprep.subr.bf16.mxu1 %v1073_v11  ;;  %v387_v11 = vsub.s32 3, %v93_v41 }
  0x64   :  { %293 = vmatpush1.bf16.msra.mxu0 %v982_v51 }
  0x65   :  { %754 = vmatprep.subr.bf16.mxu0 %v985_v54 }
  0x66   :  { %742 = vmatpush1.bf16.msra.mxu1 %v1075_v14 }
  0x67   :  { %295 = vmatmul.mubr.bf16.vlgmr.msra.gmra.mrb[0].mxu0 %v56_v57  ;;  %743 = vmatprep.subr.bf16.mxu1 %v1076_v15 }
  0x68   :  { %755 = vmatpush1.bf16.msra.mxu0 %v983_v59  ;;  %786 = vmatprep.mubr.bf16.mxu0 %v306_v60 }
  0x69   :  { %756 = vmatprep.subr.bf16.mxu0 %v988_v61  ;;  %v371_v61 = vld [vmem:[%s1255_s5] sm:$0xf] }
  0x6a   :  { %744 = vmatpush1.bf16.msra.mxu1 %v1078_v18  ;;  %v376_v62 = vrot.slane %v371_v61, %v94_v42  ;;  %v380_v63 = vrot.slane %v371_v61, %v98_v44 }
  0x6c   :  { %757 = vmatpush1.bf16.msra.mxu0 %v986_v0 }
  0x6d   :  { %758 = vmatprep.subr.bf16.mxu0 %v993_v1  ;;  %746 = vmatmul.mubr.bf16.vlgmr.msra.gmra.mrb[0].mxu1 %v305_v22 }
  0x70   :  { %759 = vmatpush1.bf16.msra.mxu0 %v991_v4 }
  0x71   :  { %760 = vmatprep.subr.bf16.mxu0 %v999_v5 }
  0x74   :  { %761 = vmatpush1.bf16.msra.mxu0 %v997_v8 }
  0x75   :  { %762 = vmatprep.subr.bf16.mxu0 %v1005_v9 }
  0x78   :  { %763 = vmatpush1.bf16.msra.mxu0 %v1003_v12  ;;  %v384_v12 = vrot.slane %v371_v61, %v383_v10 }
  0x79   :  { %764 = vmatprep.subr.bf16.mxu0 %v1011_v13  ;;  %v388_v13 = vrot.slane %v371_v61, %v387_v11 }
  0x7c   :  { %765 = vmatpush1.bf16.msra.mxu0 %v1009_v16 }
  0x7d   :  { %766 = vmatprep.subr.bf16.mxu0 %v1017_v17 }
  0x80   :  { %767 = vmatpush1.bf16.msra.mxu0 %v1015_v19 }
  0x81   :  { %768 = vmatprep.subr.bf16.mxu0 %v1023_v21 }
  0x84   :  { %769 = vmatpush1.bf16.msra.mxu0 %v1021_v23 }
  0x85   :  { %770 = vmatprep.subr.bf16.mxu0 %v1029_v24 }
  0x88   :  { %771 = vmatpush1.bf16.msra.mxu0 %v1027_v25 }
  0x89   :  { %772 = vmatprep.subr.bf16.mxu0 %v1035_v26 }
  0x8c   :  { %773 = vmatpush1.bf16.msra.mxu0 %v1033_v27 }
  0x8d   :  { %774 = vmatprep.subr.bf16.mxu0 %v1041_v28 }
  0x90   :  { %775 = vmatpush1.bf16.msra.mxu0 %v1039_v29 }
  0x91   :  { %776 = vmatprep.subr.bf16.mxu0 %v1047_v30 }
  0x94   :  { %777 = vmatpush1.bf16.msra.mxu0 %v1045_v31 }
  0x95   :  { %778 = vmatprep.subr.bf16.mxu0 %v1053_v32 }
  0x98   :  { %779 = vmatpush1.bf16.msra.mxu0 %v1051_v33 }
  0x99   :  { %780 = vmatprep.subr.bf16.mxu0 %v1059_v34 }
  0x9c   :  { %781 = vmatpush1.bf16.msra.mxu0 %v1057_v35 }
  0x9d   :  { %782 = vmatprep.subr.bf16.mxu0 %v1065_v36 }
  0xa0   :  { %783 = vmatpush1.bf16.msra.mxu0 %v1063_v37 }
  0xa1   :  { %784 = vmatprep.subr.bf16.mxu0 %v1071_v38 }
  0xa4   :  { %785 = vmatpush1.bf16.msra.mxu0 %v1069_v39 }
  0xa7   :  { %787 = vmatmul.mubr.bf16.vlgmr.msra.gmra.mrb[4].mxu0 %v305_v22 }
 0x13a   :  { %v296_v47 = vpop.f32.mrb[0].mxu0 }
 0x13b   :  { %v297_v48 = vadd.f32 %v296_v47, %v95_v45  ;;  %v298_v49 = vpop.f32.mrb[1].mxu0 }
 0x13c   :  { %v299_v50 = vadd.f32 %v298_v49, %v99_v46  ;;  %v300_v51 = vpop.f32.mrb[2].mxu0 }
 0x13d   :  { %v795_v52 = vsub.f32 0.0, %v297_v48  ;;  %v301_v53 = vpop.f32.mrb[3].mxu0 }
 0x13e   :  { %v796_v54 = vsub.f32 0.0, %v299_v50 }
 0x13f   :  { %v797_v55 = vmul.f32 1.442695, %v795_v52 }
 0x140   :  { %v799_v56 = vmul.f32 1.442695, %v796_v54  ;;  %v747_v0 = vpop.f32.mrb[0].mxu1 }
 0x141   :  { %1079 = vpow2.f32 %v797_v55  ;;  %v748_v1 = vadd.f32 %v747_v0, %v376_v62  ;;  %v749_v2 = vpop.f32.mrb[1].mxu1 }
 0x142   :  { %1081 = vpow2.f32 %v799_v56  ;;  %v750_v3 = vadd.f32 %v749_v2, %v380_v63  ;;  %v751_v4 = vpop.f32.mrb[2].mxu1 }
 0x143   :  { %v809_v5 = vmax.f32 %v748_v1, 0.0  ;;  %v752_v6 = vpop.f32.mrb[3].mxu1 }
 0x144   :  { %v810_v8 = vmax.f32 %v750_v3, 0.0 }
 0x145   :  { %811 = vst [vmem:[%s1257_s7] sm:$0xff] %v809_v5 }
 0x146   :  { %812 = vst [vmem:[%s1257_s7 + $0x8] sm:$0xff] %v810_v8 }
 0x14b   :  { %v1080_v57 = vpop.eup %1079 }
 0x14c   :  { %v1082_v58 = vpop.eup %1081  ;;  %v801_v59 = vadd.f32 1.0, %v1080_v57 }
 0x14d   :  { %v802_v60 = vadd.f32 1.0, %v1082_v58 }
 0x14e   :  { %1083 = vrcp.f32 %v801_v59 }
 0x14f   :  { %1085 = vrcp.f32 %v802_v60 }
 0x158   :  { %v1084_v7 = vpop.eup %1083 }
 0x159   :  { %v1086_v9 = vpop.eup %1085  ;;  %807 = vst [vmem:[%s1256_s6] sm:$0xff] %v1084_v7 }
 0x15a   :  { %808 = vst [vmem:[%s1256_s6 + $0x8] sm:$0xff] %v1086_v9 }
 0x17a   :  { %v788_v14 = vpop.f32.mrb[4].mxu0 }
 0x17b   :  { %v789_v15 = vadd.f32 %v788_v14, %v384_v12  ;;  %v790_v16 = vpop.f32.mrb[5].mxu0 }
 0x17c   :  { %v791_v17 = vadd.f32 %v790_v16, %v388_v13  ;;  %v792_v18 = vpop.f32.mrb[6].mxu0 }
 0x17d   :  { %v813_v19 = vmul.f32 1.442695, %v789_v15  ;;  %v793_v20 = vpop.f32.mrb[7].mxu0 }
 0x17e   :  { %v815_v21 = vmul.f32 1.442695, %v791_v17 }
 0x17f   :  { %1087 = vpow2.f32 %v813_v19 }
 0x180   :  { %1089 = vpow2.f32 %v815_v21 }
 0x189   :  { %v1088_v22 = vpop.eup %1087 }
 0x18a   :  { %v1090_v23 = vpop.eup %1089  ;;  %817 = vst [vmem:[%s1258_s8] sm:$0xff] %v1088_v22 }
 0x18b   :  { %818 = vst [vmem:[%s1258_s8 + $0x8] sm:$0xff] %v1090_v23 }
 0x18c   :  { %831 = vsyncpa [#allocation3], 1 }
 0x18d   :  { %832 = vsyncpa [#allocation5], 1 }

</bundles_post_ra>
